<compile_context>
chip_gen: v7x
topology: tpu7x:2x2x1
jax: 0.10.0
libtpu: 0.0.40
codegen_flags: <defaults>
</compile_context>

<pallas_src>
import numpy as np
import jax
import jax.numpy as jnp
from jax.experimental import pallas as pl
from jax.experimental.pallas import tpu as pltpu


_VMEM_LIMIT_BYTES = 32 * 1024 * 1024    # safe on v5e/v6e (128 MiB) and v7x (64 MiB)
_BLOCK_VMEM_BUDGET = 12 * 1024 * 1024   # target working set for the pipelined blocks


# ---------------------------------------------------------------------------
# Interpolation-matrix construction (static, host-side glue)
# ---------------------------------------------------------------------------
def _bilinear_matrix(out_size: int, in_size: int) -> np.ndarray:
    """(out_size, in_size) row-stochastic matrix, align_corners=False."""
    m = np.zeros((out_size, in_size), dtype=np.float32)
    if in_size == 1:
        m[:, 0] = 1.0
        return m
    scale = in_size / out_size
    for d in range(out_size):
        src = (d + 0.5) * scale - 0.5
        src = min(max(src, 0.0), in_size - 1.0)
        lo = int(np.floor(src))
        hi = min(lo + 1, in_size - 1)
        w_hi = src - lo
        m[d, lo] += 1.0 - w_hi
        m[d, hi] += w_hi
    return m


def _nearest_matrix(out_size: int, in_size: int) -> np.ndarray:
    """(out_size, in_size) selection matrix, PyTorch 'nearest' semantics."""
    m = np.zeros((out_size, in_size), dtype=np.float32)
    scale = in_size / out_size
    for d in range(out_size):
        src = min(int(np.floor(d * scale)), in_size - 1)
        m[d, src] = 1.0
    return m


def _interp_matrix(out_size: int, in_size: int, mode: str) -> np.ndarray:
    if mode == "bilinear":
        return _bilinear_matrix(out_size, in_size)
    return _nearest_matrix(out_size, in_size)


# ---------------------------------------------------------------------------
# Pallas kernel: (BC, in_dim) @ (in_dim, Ho*Wo) lane-dense matmul per step
# ---------------------------------------------------------------------------
def _kron_resize_kernel(x_ref, kT_ref, o_ref):
    # x_ref: (1, BC, in_dim); kT_ref: (in_dim, out_dim); o_ref: (1, BC, out_dim)
    x = x_ref[0].astype(jnp.float32)          # up-cast bf16 -> f32 (no-op for f32)
    out = jnp.dot(x, kT_ref[...], preferred_element_type=jnp.float32)
    o_ref[0] = out.astype(o_ref.dtype)


def _pallas_kron_resize(x3d: jax.Array, kT: jax.Array) -> jax.Array:
    """x3d: (G, BC, in_dim) -> (G, BC, out_dim)."""
    G, BC, in_dim = x3d.shape
    out_dim = kT.shape[1]
    return pl.pallas_call(
        _kron_resize_kernel,
        out_shape=jax.ShapeDtypeStruct((G, BC, out_dim), x3d.dtype),
        grid_spec=pltpu.PrefetchScalarGridSpec(
            num_scalar_prefetch=0,
            grid=(G,),
            in_specs=[
                pl.BlockSpec((1, BC, in_dim), lambda g: (g, 0, 0)),
                # Operator block index is constant -> stays resident in VMEM.
                pl.BlockSpec((in_dim, out_dim), lambda g: (0, 0)),
            ],
            out_specs=pl.BlockSpec((1, BC, out_dim), lambda g: (g, 0, 0)),
        ),
        compiler_params=pltpu.CompilerParams(
            dimension_semantics=("parallel",),
            vmem_limit_bytes=_VMEM_LIMIT_BYTES,
        ),
    )(x3d, kT)


def _pick_block_planes(B: int, in_dim: int, out_dim: int, itemsize: int,
                       k_bytes: int) -> int:
    """Planes per grid step: divisor of B, VMEM-bounded, >=2 steps if possible."""
    budget = max(1 << 20, _BLOCK_VMEM_BUDGET - k_bytes)
    per_plane = 2 * itemsize * (in_dim + out_dim)   # double-buffered in + out
    cap = max(1, budget // per_plane)
    target = min(B, 512, cap)
    if B >= 2:
        # keep at least two grid steps so v7x's two TensorCores both get work
        target = min(target, max(1, B // 2))
    bc = max(1, int(target))
    while B % bc != 0:
        bc -= 1
    return bc


# ---------------------------------------------------------------------------
# Module equivalent
# ---------------------------------------------------------------------------
class RoiCropResize:
    """JAX/Pallas port of hat RoiCropResize (NCHW feature maps)."""

    def __init__(self, in_strides, target_stride, output_size, roi_box,
                 resize_mode="bilinear"):
        self.in_strides = list(in_strides)
        self.target_stride = target_stride
        self.output_size = tuple(int(s) for s in output_size)
        self.roi_box = [int(x) for x in roi_box]
        assert resize_mode in ("bilinear", "nearest")
        self.resize_mode = resize_mode
        # TODO(synk): a gather-style kernel would avoid the all-zero multiplies
        # of the 'nearest' selection matrix; the matmul form is kept since the
        # op is memory-bound at these sizes.

    def __call__(self, data):
        cur_feat = data[self.in_strides.index(self.target_stride)]
        N, C, H, W = cur_feat.shape
        x1, y1, x2, y2 = self.roi_box
        Hc, Wc = y2 - y1, x2 - x1
        Ho, Wo = self.output_size
        out_dim = Ho * Wo

        ry = _interp_matrix(Ho, Hc, self.resize_mode)        # (Ho, Hc)
        rx = _interp_matrix(Wo, Wc, self.resize_mode)        # (Wo, Wc)

        # Fold the static crop into the operator when the crop covers a decent
        # fraction of the map: no crop is then materialized in HBM and the
        # kernel input is a free contiguous reshape of the full feature map.
        fold_crop = (H * W) <= 4 * (Hc * Wc)
        if fold_crop:
            ry_full = np.zeros((Ho, H), dtype=np.float32)
            ry_full[:, y1:y2] = ry
            rx_full = np.zeros((Wo, W), dtype=np.float32)
            rx_full[:, x1:x2] = rx
            kT_np = np.ascontiguousarray(np.kron(ry_full, rx_full).T)  # (H*W, Ho*Wo)
            x2d = cur_feat.reshape(N * C, H * W)                       # free reshape
        else:
            kT_np = np.ascontiguousarray(np.kron(ry, rx).T)            # (Hc*Wc, Ho*Wo)
            roi = cur_feat[:, :, y1:y2, x1:x2]
            x2d = roi.reshape(N * C, Hc * Wc)

        # Interpolation weights stay float32 regardless of feature dtype.
        kT = jnp.asarray(kT_np, dtype=jnp.float32)
        in_dim = kT_np.shape[0]

        B = N * C
        BC = _pick_block_planes(B, in_dim, out_dim,
                                int(cur_feat.dtype.itemsize),
                                int(kT_np.size * 4))
        G = B // BC
        x3d = x2d.reshape(G, BC, in_dim)                     # free reshape

        out = _pallas_kron_resize(x3d, kT)                   # (G, BC, Ho*Wo)
        return out.reshape(N, C, Ho, Wo)
        # TODO(synk): for very large crops (Hc*Wc in the many-thousands) the
        # dense Kronecker operator stops fitting VMEM; a two-pass
        # Ry @ X @ Rx^T Pallas kernel would be the right fallback there.


# ---------------------------------------------------------------------------
# Demo / self-check
# ---------------------------------------------------------------------------
if __name__ == "__main__":
    key = jax.random.PRNGKey(0)
    k4, k8 = jax.random.split(key)

    # Feature pyramid: strides [4, 8].
    N, C = 2, 4
    feat_s4 = jax.random.normal(k4, (N, C, 32, 32), dtype=jnp.float32)
    feat_s8 = jax.random.normal(k8, (N, C, 16, 16), dtype=jnp.float32)
    data = [feat_s4, feat_s8]

    # Case 1: bilinear, crop covers a large part of the 16x16 map
    # -> crop folded into the Kronecker operator (fully fused path).
    roi_box = [2, 3, 12, 11]                  # x1, y1, x2, y2 -> crop H=8, W=10
    output_size = (16, 16)
    mod = RoiCropResize(in_strides=[4, 8], target_stride=8,
                        output_size=output_size, roi_box=roi_box,
                        resize_mode="bilinear")
    out = mod(data)
    jax.block_until_ready(out)
    assert out.shape == (N, C, output_size[0], output_size[1])

    x1, y1, x2, y2 = roi_box
    crop = feat_s8[:, :, y1:y2, x1:x2]
    ry = jnp.asarray(_bilinear_matrix(output_size[0], crop.shape[2]))
    rx = jnp.asarray(_bilinear_matrix(output_size[1], crop.shape[3]))
    ref = jnp.einsum("oh,nchw,pw->ncop", ry, crop, rx)
    np.testing.assert_allclose(np.asarray(out), np.asarray(ref),
                               rtol=1e-5, atol=1e-5)

    # Case 2: nearest, small crop of the larger 32x32 map
    # -> XLA crop + compact operator path.
    roi_box2 = [1, 2, 9, 10]                  # crop H=8, W=8
    mod2 = RoiCropResize(in_strides=[4, 8], target_stride=4,
                         output_size=(16, 16), roi_box=roi_box2,
                         resize_mode="nearest")
    out2 = mod2(data)
    jax.block_until_ready(out2)
    assert out2.shape == (N, C, 16, 16)

    xx1, yy1, xx2, yy2 = roi_box2
    crop2 = feat_s4[:, :, yy1:yy2, xx1:xx2]
    ry2 = jnp.asarray(_nearest_matrix(16, crop2.shape[2]))
    rx2 = jnp.asarray(_nearest_matrix(16, crop2.shape[3]))
    ref2 = jnp.einsum("oh,nchw,pw->ncop", ry2, crop2, rx2)
    np.testing.assert_allclose(np.asarray(out2), np.asarray(ref2),
                               rtol=1e-5, atol=1e-5)

    print("KERNEL_OK")
</pallas_src>

<mosaic_0001>
module attributes {stable_mosaic.version = 11 : i64} {
  func.func @_kron_resize_kernel(%arg0: i32, %arg1: memref<1x4x256xf32, #tpu.memory_space<vmem>>, %arg2: memref<256x256xf32, #tpu.memory_space<vmem>>, %arg3: memref<1x4x256xf32, #tpu.memory_space<vmem>>) attributes {dimension_semantics = [#tpu.dimension_semantics<parallel>], iteration_bounds = array<i64: 2>, scalar_prefetch = 0 : i64, scratch_operands = 0 : i64, tpu.core_type = #tpu.core_type<tc>, window_params = [{transform_indices = @transform_0, window_bounds = array<i64: 1, 4, 256>}, {pipeline_mode = #tpu.pipeline_mode<synchronous>, transform_indices = @transform_1, window_bounds = array<i64: 256, 256>}, {transform_indices = @transform_2, window_bounds = array<i64: 1, 4, 256>}]} {
    %c0 = arith.constant 0 : index
    %c0_0 = arith.constant 0 : index
    %c0_1 = arith.constant 0 : index
    %0 = vector.load %arg1[%c0, %c0_0, %c0_1] : memref<1x4x256xf32, #tpu.memory_space<vmem>>, vector<1x4x256xf32>
    %1 = vector.shape_cast %0 : vector<1x4x256xf32> to vector<4x256xf32>
    %c0_2 = arith.constant 0 : index
    %c0_3 = arith.constant 0 : index
    %2 = vector.load %arg2[%c0_2, %c0_3] : memref<256x256xf32, #tpu.memory_space<vmem>>, vector<256x256xf32>
    %cst = arith.constant dense<0.000000e+00> : vector<4x256xf32>
    %3 = tpu.matmul %1, %2, %cst {dimension_numbers = #tpu.dot_dimension_numbers<[1], [0], [0], [1], [0, 0, 1, 1], [], []>} : vector<4x256xf32>, vector<256x256xf32>, vector<4x256xf32> -> vector<4x256xf32>
    %c0_4 = arith.constant 0 : index
    %c0_5 = arith.constant 0 : index
    %c0_6 = arith.constant 0 : index
    %4 = vector.load %arg3[%c0_4, %c0_5, %c0_6] : memref<1x4x256xf32, #tpu.memory_space<vmem>>, vector<1x4x256xf32>
    %5 = vector.shape_cast %4 : vector<1x4x256xf32> to vector<4x256xf32>
    %6 = vector.shape_cast %3 : vector<4x256xf32> to vector<1x4x256xf32>
    tpu.vector_store %arg3[%c0_4, %c0_5, %c0_6], %6 {strides = array<i32>} : memref<1x4x256xf32, #tpu.memory_space<vmem>>, vector<1x4x256xf32>,
    return
  }
  func.func @transform_0(%arg0: i32) -> (i32, i32, i32) {
    %c0_i32 = arith.constant 0 : i32
    %c0_i32_0 = arith.constant 0 : i32
    %c0_i32_1 = arith.constant 0 : i32
    return %arg0, %c0_i32, %c0_i32_0 : i32, i32, i32
  }
  func.func @transform_1(%arg0: i32) -> (i32, i32) {
    %c0_i32 = arith.constant 0 : i32
    %c0_i32_0 = arith.constant 0 : i32
    %c0_i32_1 = arith.constant 0 : i32
    return %c0_i32, %c0_i32_0 : i32, i32
  }
  func.func @transform_2(%arg0: i32) -> (i32, i32, i32) {
    %c0_i32 = arith.constant 0 : i32
    %c0_i32_0 = arith.constant 0 : i32
    %c0_i32_1 = arith.constant 0 : i32
    return %arg0, %c0_i32, %c0_i32_0 : i32, i32, i32
  }
}

</mosaic_0001>

<bundles_post_ra>
// kernel: tpu_custom_call.1
= control target key start
LH: loop header
LB: loop body
LE: loop exit
PB: predicated region body
PF: predicated region fallthrough
CT: control target
= control target key end

     0   :  { %7 = vsyncpa [#allocation3], 0  ;;  %s914_s0 = inlined_call_operand.hbm [shape: f32[2,4,256], index: 0, kind: input, shape index: {}]   ;;  %s915_s1 = inlined_call_operand.hbm [shape: f32[256,256], index: 1, kind: input, shape index: {}]   ;;  %s916_s2 = inlined_call_operand.hbm [shape: f32[2,4,256], index: 2, kind: output, shape index: {}]  }
   0x1   :  { %9 = vsyncpa [#allocation3 + $0x1], 0 }
   0x2   :  { %10 = vsyncpa [#allocation6], 0 }
   0x3   :  { %11 = vsyncpa [#allocation4], 0 }
   0x4   :  { %13 = vsyncpa [#allocation4 + $0x1], 0  ;;  %s706_s9 = smov 0   ;;  %s708_s10 = smov 0  }
   0x5   :  { %s710_s11 = smov 0   ;;  %s712_s12 = smov 0  }
   0x6 LB: > { %s727_s13 = sadd.s32 4294967295, %s684_s12   ;;  %s414_s14 = sadd.s32 4294967294, %s684_s12   ;;  %s684_s12 = sphi %s712_s12, %s936_s12   ;;  %s680_s11 = sphi %s710_s11, %s935_s11   ;;  %s676_s10 = sphi %s708_s10, %s934_s10   ;;  %s672_s9 = sphi %s706_s9, %s933_s9  }
   0x7   : > { %p39_p0 = scmp.ne.s32.totalorder %s676_s10, %s672_s9  ;;  %p917_p1 = scmp.eq.s32.totalorder %s727_s13, 0 }
   0x8   : > { %p90_p3 = scmp.eq.s32.totalorder %s414_s14, 1  ;;  %p415_p5 = scmp.ge.s32.totalorder %s684_s12, 1 }
   0x9   : > { %p736_p4 = por %p917_p1, %p39_p0  ;;  %p97_p7 = scmp.lt.s32.totalorder %s684_s12, 3 }
   0xa   : > { %p741_p6 = por %p90_p3, %p39_p0  ;;  %s686_s18 = smov [#allocation5]  }
   0xb   : > { %s920_s15 = scalar_select %p736_p4, 1, 0 }
   0xc   : > { %s921_s16 = scalar_select %p741_p6, 1, 0 }
   0xd   : > { %p746_p8 = pnand %p415_p5, %p97_p7  ;;  %s109_s19 = sshll.u32 %s686_s18, 4  ;;  %s750_s19 = int_to_ptr.vmem [resolvable:$true] %s109_s19 }
   0xe   : > { %s762_s21 = sadd.s32 1, %s684_s12   ;;  %s26_s22 = sadd.s32 1, %s680_s11 }
   0xf   : > { %s922_s17 = scalar_select %p746_p8, 1, 0 }
  0x10   : > { %p504_p9 = pneg %p746_p8  ;;  %s23_s23 = ssub.s32 %s684_s12, %s762_s21 }
  0x11   : > { %s556_s26 = scalar_lea.hbm %s915_s1, 8192 }
  0x12   : > { %p757_p11 = pnand %p504_p9, %p917_p1  ;;  %p557_p12 = scmp.ne.s32.totalorder %s915_s1, %s556_s26 }
  0x13   : > { %p563_p5 = scmp.lt.u32.totalorder %s556_s26, %s915_s1 }
  0x14   : > { %p558_p13 = pneg %p757_p11 }
  0x16   : > { %p559_p0 = pnand %p558_p13, %p557_p12 }
  0x18   : > { %p560_p3 = pneg %p559_p0 }
  0x1a   : > { %p565_p7 = pnand %p563_p5, %p560_p3 }
  0x1c   : > { %568 = shalt.err (!%p565_p7)
}
  0x1d   : > { %s569_s3 = scalar_lea.vmem %s750_s19, 8192  ;;  %p577_p2 = scmp.lt.s32.totalorder %s750_s19, %s750_s19 }
  0x1e   : > { %p570_p9 = scmp.ne.s32.totalorder %s750_s19, %s569_s3  ;;  %p578_p6 = scmp.lt.s32.totalorder %s569_s3, %s569_s3 }
  0x20   : > { %p572_p10 = pnand %p570_p9, %p558_p13  ;;  %p579_p4 = por %p578_p6, %p577_p2 }
  0x22   : > { %p573_p1 = pneg %p572_p10 }
  0x24   : > { %p580_p8 = pnand %p579_p4, %p573_p1 }
  0x26   : > { %583 = shalt.err (!%p580_p8)
}
  0x27   : > { %s687_s4 = smov 256   ;;  %s688_s5 = smov 16  }
  0x28   : > { %507 = dma.hbm_to_vmem [thread:$0]  (!%p757_p11), %s915_s1, 8192, %s750_s19, [#allocation6], %s687_s4, %s687_s4, %s688_s5  }
  0x29   : > { %p24_p2 = scmp.eq.s32.totalorder %s23_s23, 0  ;;  %p33_p1 = scmp.ne.s32.totalorder %s680_s11, %s676_s10 }
  0x2a   : > { %p34_p4 = scmp.eq.s32.totalorder %s684_s12, 0  ;;  %p517_p6 = scmp.lt.s32.totalorder %s684_s12, 2 }
  0x2b   : > { %s793_s8 = scalar_select %p24_p2, %s680_s11, %s26_s22  }
  0x2c   : > { %p35_p8 = por %p34_p4, %p33_p1  ;;  %p924_p10 = scmp.eq.s32.totalorder %s727_s13, 1 }
  0x2d   : > { %s123_s18 = sand.u32 1, %s680_s11   ;;  %s430_s24 = sshll.u32 %s684_s12, 7 }
  0x2e   : > { %p797_p12 = por %p924_p10, %p33_p1  ;;  %s418_s25 = sshll.u32 %s123_s18, 3 }
  0x2f   : > { %s806_s27 = scalar_lea.hbm %s914_s0, %s430_s24  ;;  %s127_s19 = scalar_lea.vmem [#allocation2], %s418_s25 }
  0x30   : > { %s135_s22 = sshll.u32 %s127_s19, 4  ;;  %p808_p11 = pnand %p517_p6, %p35_p8  ;;  %s812_s22 = int_to_ptr.vmem [resolvable:$true] %s135_s22 }
  0x31   : > { %s124_s28 = scalar_lea.sflag [#allocation3], %s123_s18  ;;  %s584_s29 = scalar_lea.hbm %s806_s27, 128 }
  0x32   : > { %p585_p13 = scmp.ne.s32.totalorder %s806_s27, %s584_s29  ;;  %p586_p0 = pneg %p808_p11 }
  0x33   : > { %s589_s4 = scalar_lea.hbm %s914_s0, 256  ;;  %p590_p7 = scmp.lt.u32.totalorder %s806_s27, %s914_s0 }
  0x34   : > { %p587_p3 = pnand %p586_p0, %p585_p13  ;;  %p591_p9 = scmp.lt.u32.totalorder %s589_s4, %s584_s29 }
  0x35   : > { %p593_p1 = scmp.lt.u32.totalorder %s584_s29, %s806_s27 }
  0x36   : > { %p588_p5 = pneg %p587_p3  ;;  %p592_p2 = por %p591_p9, %p590_p7 }
  0x38   : > { %p594_p4 = por %p593_p1, %p592_p2 }
  0x3a   : > { %p595_p6 = pnand %p594_p4, %p588_p5 }
  0x3c   : > { %598 = shalt.err (!%p595_p6)
}
  0x3d   : > { %s599_s7 = scalar_lea.vmem %s812_s22, 128  ;;  %s689_s18 = smov [#allocation2]  }
  0x3e   : > { %p600_p8 = scmp.ne.s32.totalorder %s812_s22, %s599_s7  ;;  %s604_s24 = sshll.u32 %s689_s18, 4  ;;  %s605_s24 = int_to_ptr.vmem [resolvable:$false] %s604_s24 }
  0x3f   : > { %s606_s25 = scalar_lea.vmem %s605_s24, 256  ;;  %p607_p3 = scmp.lt.s32.totalorder %s812_s22, %s605_s24 }
  0x40   : > { %p602_p10 = pnand %p600_p8, %p586_p0  ;;  %p608_p7 = scmp.lt.s32.totalorder %s606_s25, %s599_s7 }
  0x42   : > { %p603_p13 = pneg %p602_p10  ;;  %p609_p9 = por %p608_p7, %p607_p3 }
  0x44   : > { %p610_p2 = pnand %p609_p9, %p603_p13 }
  0x46   : > { %613 = shalt.err (!%p610_p2)
}
  0x47   : > { %511 = dma.hbm_to_vmem [thread:$0]  (!%p808_p11), %s806_s27, 128, %s812_s22, %s124_s28  }
  0x48   : > { %p927_p5 = scmp.ne.s32.totalorder %s922_s17, 0 }
  0x49   : > { %s842_s20 = sand.u32 (!%p927_p5), 1, %s676_s10   ;;  %p928_p0 = scmp.ne.s32.totalorder (!%p927_p5), %s920_s15, 0 }
  0x4a   : > { %144 = sbr.rel (%p927_p5) target bundleno = 381 (0x17d), region = 28  ;;  %s422_s26 = sshll.u32 (!%p927_p5), %s842_s20, 3 }
  0x4b   : > { %s147_s19 = scalar_lea.sflag (!%p927_p5), [#allocation3], %s842_s20  ;;  %s848_s29 = scalar_lea.vmem (!%p927_p5), [#allocation2], %s422_s26 }
  0x51   : > { %659 = dma.done.wait (%p928_p0), %s147_s19, 128  }
  0x52   : > { %661 = vsyncadd (%p928_p0), %s147_s19, 4294967168  ;;  %p929_p11 = scmp.eq.s32.totalorder %s727_s13, 0 }
  0x54   : > { %663 = dma.done.wait (%p929_p11), [#allocation6], 8192   ;;  %p930_p1 = pmov %p929_p11 }
  0x55   : > { %v177_v0 = vld [vmem:[#allocation5 + $0x8] sm:$0xff]  ;;  %v179_v1 = vld [vmem:[#allocation5 + $0x18] sm:$0xff]  ;;  %v176_v2 = vld [vmem:[#allocation5] sm:$0xff]  ;;  %s431_s15 = sshll.u32 %s727_s13, 7  ;;  %s174_s17 = scalar_lea.vmem [#allocation7], %s422_s26 }
  0x56   : > { %665 = vsyncadd (%p930_p1), [#allocation6], 4294959104  ;;  %v432_v3 = vpack.c.bf16 %v179_v1, %v177_v0  ;;  %v178_v4 = vld [vmem:[#allocation5 + $0x10] sm:$0xff]  ;;  %v181_v5 = vld [vmem:[#allocation5 + $0x28] sm:$0xff]  ;;  %s334_s27 = sshll.u32 %s174_s17, 4  ;;  %s870_s28 = scalar_lea.hbm %s916_s2, %s431_s15  ;;  %s872_s27 = int_to_ptr.vmem [resolvable:$true] %s334_s27 }
  0x57   : > { %v183_v6 = vld [vmem:[#allocation5 + $0x38] sm:$0xff]  ;;  %v434_v7 = vpack.c.bf16 %v178_v4, %v176_v2  ;;  %v180_v9 = vld [vmem:[#allocation5 + $0x20] sm:$0xff]  ;;  %v182_v10 = vld [vmem:[#allocation5 + $0x30] sm:$0xff]  ;;  %s320_s30 = scalar_lea.sflag [#allocation4], %s842_s20  ;;  %s614_s3 = scalar_lea.vmem %s872_s27, 128 }
  0x58   : > { %v436_v8 = vpack.c.bf16 %v183_v6, %v181_v5  ;;  %v185_v11 = vld [vmem:[#allocation5 + $0x48] sm:$0xff]  ;;  %433 = vmatprep.subr.bf16.mxu0 %v432_v3  ;;  %v187_v12 = vld [vmem:[#allocation5 + $0x58] sm:$0xff]  ;;  %v438_v13 = vpack.c.bf16 %v182_v10, %v180_v9  ;;  %v184_v15 = vld [vmem:[#allocation5 + $0x40] sm:$0xff]  ;;  %p615_p4 = scmp.ne.s32.totalorder %s872_s27, %s614_s3  ;;  %s690_s13 = smov [#allocation7]  }
  0x59   : > { %435 = vmatpush1.bf16.msra.mxu0 %v434_v7  ;;  %v440_v14 = vpack.c.bf16 %v187_v12, %v185_v11  ;;  %v186_v16 = vld [vmem:[#allocation5 + $0x50] sm:$0xff]  ;;  %v189_v17 = vld [vmem:[#allocation5 + $0x68] sm:$0xff]  ;;  %v191_v18 = vld [vmem:[#allocation5 + $0x78] sm:$0xff]  ;;  %s618_s4 = sshll.u32 %s690_s13, 4  ;;  %s619_s4 = int_to_ptr.vmem [resolvable:$false] %s618_s4 }
  0x5a   : > { %437 = vmatprep.subr.bf16.mxu0 %v436_v8  ;;  %v442_v19 = vpack.c.bf16 %v186_v16, %v184_v15  ;;  %v444_v20 = vpack.c.bf16 %v191_v18, %v189_v17  ;;  %v188_v21 = vld [vmem:[#allocation5 + $0x60] sm:$0xff]  ;;  %v190_v22 = vld [vmem:[#allocation5 + $0x70] sm:$0xff]  ;;  %v193_v23 = vld [vmem:[#allocation5 + $0x88] sm:$0xff]  ;;  %p616_p6 = pnand %p615_p4, %p797_p12  ;;  %s620_s5 = scalar_lea.vmem %s619_s4, 256 }
  0x5b   : > { %v195_v24 = vld [vmem:[#allocation5 + $0x98] sm:$0xff]  ;;  %v446_v25 = vpack.c.bf16 %v190_v22, %v188_v21  ;;  %v192_v27 = vld [vmem:[#allocation5 + $0x80] sm:$0xff]  ;;  %v194_v28 = vld [vmem:[#allocation5 + $0x90] sm:$0xff]  ;;  %p621_p10 = scmp.lt.s32.totalorder %s872_s27, %s619_s4  ;;  %p622_p13 = scmp.lt.s32.totalorder %s620_s5, %s614_s3 }
  0x5c   : > { %v448_v26 = vpack.c.bf16 %v195_v24, %v193_v23  ;;  %v197_v29 = vld [vmem:[#allocation5 + $0xa8] sm:$0xff]  ;;  %v199_v30 = vld [vmem:[#allocation5 + $0xb8] sm:$0xff]  ;;  %v450_v31 = vpack.c.bf16 %v194_v28, %v192_v27  ;;  %v196_v33 = vld [vmem:[#allocation5 + $0xa0] sm:$0xff]  ;;  %p617_p8 = pneg %p616_p6 }
  0x5d   : > { %439 = vmatpush1.bf16.msra.mxu0 %v438_v13  ;;  %v452_v32 = vpack.c.bf16 %v199_v30, %v197_v29  ;;  %v198_v34 = vld [vmem:[#allocation5 + $0xb0] sm:$0xff]  ;;  %v201_v35 = vld [vmem:[#allocation5 + $0xc8] sm:$0xff]  ;;  %v203_v36 = vld [vmem:[#allocation5 + $0xd8] sm:$0xff]  ;;  %p623_p3 = por %p622_p13, %p621_p10 }
  0x5e   : > { %441 = vmatprep.subr.bf16.mxu0 %v440_v14  ;;  %v454_v37 = vpack.c.bf16 %v198_v34, %v196_v33  ;;  %v456_v38 = vpack.c.bf16 %v203_v36, %v201_v35  ;;  %v200_v39 = vld [vmem:[#allocation5 + $0xc0] sm:$0xff]  ;;  %v202_v40 = vld [vmem:[#allocation5 + $0xd0] sm:$0xff]  ;;  %v205_v42 = vld [vmem:[#allocation5 + $0xe8] sm:$0xff] }
  0x5f   : > { %v859_v41 = vld [vmem:[%s848_s29] sm:$0xff]  ;;  %v458_v45 = vpack.c.bf16 %v202_v40, %v200_v39  ;;  %v204_v47 = vld [vmem:[#allocation5 + $0xe0] sm:$0xff]  ;;  %v209_v49 = vld [vmem:[#allocation5 + $0x108] sm:$0xff]  ;;  %p624_p7 = pnand %p623_p3, %p617_p8 }
  0x60   : > { %v207_v43 = vld [vmem:[#allocation5 + $0xf8] sm:$0xff]  ;;  %v241_v44 = vcombine.high %v859_v41, %v859_v41  ;;  %v206_v48 = vld [vmem:[#allocation5 + $0xf0] sm:$0xff]  ;;  %v208_v53 = vld [vmem:[#allocation5 + $0x100] sm:$0xff] }
  0x61   : > { %443 = vmatpush1.bf16.msra.mxu0 %v442_v19  ;;  %v460_v46 = vpack.c.bf16 %v207_v43, %v205_v42  ;;  %v211_v50 = vld [vmem:[#allocation5 + $0x118] sm:$0xff]  ;;  %v462_v51 = vpack.c.bf16 %v206_v48, %v204_v47  ;;  %v210_v54 = vld [vmem:[#allocation5 + $0x110] sm:$0xff]  ;;  %v213_v55 = vld [vmem:[#allocation5 + $0x128] sm:$0xff] }
  0x62   : > { %445 = vmatprep.subr.bf16.mxu0 %v444_v20  ;;  %307 = vmatprep.mubr.f32.mxu0 %v241_v44  ;;  %v464_v52 = vpack.c.bf16 %v211_v50, %v209_v49  ;;  %v215_v56 = vld [vmem:[#allocation5 + $0x138] sm:$0xff]  ;;  %v466_v57 = vpack.c.bf16 %v210_v54, %v208_v53  ;;  %v212_v59 = vld [vmem:[#allocation5 + $0x120] sm:$0xff]  ;;  %v214_v60 = vld [vmem:[#allocation5 + $0x130] sm:$0xff] }
  0x63   : > { %v468_v58 = vpack.c.bf16 %v215_v56, %v213_v55  ;;  %v217_v61 = vld [vmem:[#allocation5 + $0x148] sm:$0xff]  ;;  %v219_v62 = vld [vmem:[#allocation5 + $0x158] sm:$0xff]  ;;  %v470_v63 = vpack.c.bf16 %v214_v60, %v212_v59  ;;  %v216_v1 = vld [vmem:[#allocation5 + $0x140] sm:$0xff] }
  0x64   : > { %v472_v0 = vpack.c.bf16 %v219_v62, %v217_v61  ;;  %v218_v2 = vld [vmem:[#allocation5 + $0x150] sm:$0xff]  ;;  %v221_v3 = vld [vmem:[#allocation5 + $0x168] sm:$0xff]  ;;  %v223_v4 = vld [vmem:[#allocation5 + $0x178] sm:$0xff] }
  0x65   : > { %447 = vmatpush1.bf16.msra.mxu0 %v446_v25  ;;  %v474_v5 = vpack.c.bf16 %v218_v2, %v216_v1  ;;  %v476_v6 = vpack.c.bf16 %v223_v4, %v221_v3  ;;  %v220_v7 = vld [vmem:[#allocation5 + $0x160] sm:$0xff]  ;;  %v222_v8 = vld [vmem:[#allocation5 + $0x170] sm:$0xff]  ;;  %v225_v9 = vld [vmem:[#allocation5 + $0x188] sm:$0xff] }
  0x66   : > { %449 = vmatprep.subr.bf16.mxu0 %v448_v26  ;;  %v227_v10 = vld [vmem:[#allocation5 + $0x198] sm:$0xff]  ;;  %v478_v11 = vpack.c.bf16 %v222_v8, %v220_v7  ;;  %v224_v13 = vld [vmem:[#allocation5 + $0x180] sm:$0xff]  ;;  %v226_v14 = vld [vmem:[#allocation5 + $0x190] sm:$0xff] }
  0x67   : > { %v480_v12 = vpack.c.bf16 %v227_v10, %v225_v9  ;;  %v229_v15 = vld [vmem:[#allocation5 + $0x1a8] sm:$0xff]  ;;  %v231_v16 = vld [vmem:[#allocation5 + $0x1b8] sm:$0xff]  ;;  %v482_v17 = vpack.c.bf16 %v226_v14, %v224_v13  ;;  %v228_v19 = vld [vmem:[#allocation5 + $0x1a0] sm:$0xff] }
  0x68   : > { %v484_v18 = vpack.c.bf16 %v231_v16, %v229_v15  ;;  %v230_v20 = vld [vmem:[#allocation5 + $0x1b0] sm:$0xff]  ;;  %v233_v21 = vld [vmem:[#allocation5 + $0x1c8] sm:$0xff]  ;;  %v235_v22 = vld [vmem:[#allocation5 + $0x1d8] sm:$0xff] }
  0x69   : > { %451 = vmatpush1.bf16.msra.mxu0 %v450_v31  ;;  %v486_v23 = vpack.c.bf16 %v230_v20, %v228_v19  ;;  %v488_v24 = vpack.c.bf16 %v235_v22, %v233_v21  ;;  %v232_v25 = vld [vmem:[#allocation5 + $0x1c0] sm:$0xff]  ;;  %v234_v26 = vld [vmem:[#allocation5 + $0x1d0] sm:$0xff]  ;;  %v237_v27 = vld [vmem:[#allocation5 + $0x1e8] sm:$0xff] }
  0x6a   : > { %453 = vmatprep.subr.bf16.mxu0 %v452_v32  ;;  %v239_v28 = vld [vmem:[#allocation5 + $0x1f8] sm:$0xff]  ;;  %v490_v29 = vpack.c.bf16 %v234_v26, %v232_v25  ;;  %v236_v31 = vld [vmem:[#allocation5 + $0x1e0] sm:$0xff]  ;;  %v238_v32 = vld [vmem:[#allocation5 + $0x1f0] sm:$0xff] }
  0x6b   : > { %v492_v30 = vpack.c.bf16 %v239_v28, %v237_v27  ;;  %v494_v33 = vpack.c.bf16 %v238_v32, %v236_v31 }
  0x6d   : > { %455 = vmatpush1.bf16.msra.mxu0 %v454_v37 }
  0x6e   : > { %457 = vmatprep.subr.bf16.mxu0 %v456_v38 }
  0x71   : > { %459 = vmatpush1.bf16.msra.mxu0 %v458_v45 }
  0x72   : > { %461 = vmatprep.subr.bf16.mxu0 %v460_v46 }
  0x75   : > { %463 = vmatpush1.bf16.msra.mxu0 %v462_v51 }
  0x76   : > { %465 = vmatprep.subr.bf16.mxu0 %v464_v52 }
  0x79   : > { %467 = vmatpush1.bf16.msra.mxu0 %v466_v57 }
  0x7a   : > { %469 = vmatprep.subr.bf16.mxu0 %v468_v58 }
  0x7d   : > { %471 = vmatpush1.bf16.msra.mxu0 %v470_v63 }
  0x7e   : > { %473 = vmatprep.subr.bf16.mxu0 %v472_v0 }
  0x81   : > { %475 = vmatpush1.bf16.msra.mxu0 %v474_v5 }
  0x82   : > { %477 = vmatprep.subr.bf16.mxu0 %v476_v6 }
  0x85   : > { %479 = vmatpush1.bf16.msra.mxu0 %v478_v11 }
  0x86   : > { %481 = vmatprep.subr.bf16.mxu0 %v480_v12 }
  0x89   : > { %483 = vmatpush1.bf16.msra.mxu0 %v482_v17 }
  0x8a   : > { %485 = vmatprep.subr.bf16.mxu0 %v484_v18 }
  0x8d   : > { %487 = vmatpush1.bf16.msra.mxu0 %v486_v23 }
  0x8e   : > { %489 = vmatprep.subr.bf16.mxu0 %v488_v24 }
  0x91   : > { %491 = vmatpush1.bf16.msra.mxu0 %v490_v29 }
  0x92   : > { %493 = vmatprep.subr.bf16.mxu0 %v492_v30 }
  0x95   : > { %495 = vmatpush1.bf16.msra.mxu0 %v494_v33 }
  0x98   : > { %308 = vmatmul.mubr.f32.vlgmr.msra.gmra.mrb[0].mxu0 %v859_v41 }
 0x16b   : > { %v309_v34 = vpop.f32.mrb[0].mxu0 }
 0x16c   : > { %v311_v35 = vpop.f32.mrb[1].mxu0 }
 0x16d   : > { %v316_v36 = vcombine.low %v309_v34, %v311_v35 }
 0x16f   : > { %318 = vst [vmem:[%s174_s17] sm:$0xff] %v316_v36 }
 0x170   : > { %627 = shalt.err (!%p624_p7)
}
 0x171   : > { %s628_s6 = scalar_lea.hbm %s870_s28, 128  ;;  %s632_s24 = scalar_lea.hbm %s916_s2, 256 }
 0x172   : > { %p629_p9 = scmp.ne.s32.totalorder %s870_s28, %s628_s6  ;;  %p633_p0 = scmp.lt.u32.totalorder %s870_s28, %s916_s2 }
 0x173   : > { %p634_p11 = scmp.lt.u32.totalorder %s632_s24, %s628_s6  ;;  %p636_p4 = scmp.lt.u32.totalorder %s628_s6, %s870_s28 }
 0x174   : > { %p630_p2 = pnand %p629_p9, %p797_p12 }
 0x175   : > { %p635_p1 = por %p634_p11, %p633_p0 }
 0x176   : > { %p631_p5 = pneg %p630_p2 }
 0x177   : > { %p637_p6 = por %p636_p4, %p635_p1 }
 0x179   : > { %p638_p8 = pnand %p637_p6, %p631_p5 }
 0x17b   : > { %641 = shalt.err (!%p638_p8)
}
 0x17c   : > { %502 = dma.vmem_to_hbm [thread:$0]  (%p797_p12), %s872_s27, 128, %s870_s28, %s320_s30  }
 0x17d PF: > { %s346_s26 = sand.u32 1, %s672_s9   ;;  %p931_p10 = scmp.ne.s32.totalorder %s921_s16, 0 }
 0x17e   : > { %p932_p13 = scmp.ge.s32.totalorder %s684_s12, 2  ;;  %s347_s19 = scalar_lea.sflag [#allocation4], %s346_s26 }
 0x180   : > { %p513_p3 = pnand %p932_p13, %p931_p10 }
 0x182   : > { %667 = dma.done.wait (!%p513_p3), %s347_s19, 128  }
 0x183   : > { %669 = vsyncadd (!%p513_p3), %s347_s19, 4294967168  ;;  %p16_p7 = scmp.ge.s32.totalorder %s762_s21, 4   ;;  %s933_s9 = smov %s676_s10 }
 0x184   : > { %s934_s10 = smov %s680_s11  ;;  %s935_s11 = smov %s793_s8 }
 0x185   : > { %s936_s12 = smov %s762_s21  ;;  %18 = sbr.rel (!%p16_p7) target bundleno = 6 (0x6), region = 77 }
 0x18c   :  { %352 = vsyncpa [#allocation3], 1 }
 0x18d   :  { %354 = vsyncpa [#allocation3 + $0x1], 1 }
 0x18e   :  { %355 = vsyncpa [#allocation6], 1 }
 0x18f   :  { %356 = vsyncpa [#allocation4], 1 }
 0x190   :  { %358 = vsyncpa [#allocation4 + $0x1], 1 }

</bundles_post_ra>
